<compile_context>
chip_gen: v5e
topology: v5e:2x2
jax: 0.10.0
libtpu: 0.0.40
codegen_flags: <defaults>
</compile_context>

<pallas_src>
import functools
import math

import jax
import jax.numpy as jnp
from jax.experimental import pallas as pl
from jax.experimental.pallas import tpu as pltpu

_LANE = 128
_SUBLANE = 8
_TWO_PI = 2.0 * math.pi


def _sketch_rnn_loss_kernel(ym_ref, px_ref, out_ref, lsp_ref, *,
                            M, sb, tile, sub, inv_nmax, needs_mask):
    """One grid step = one TILE-wide slab of the flattened (S*B) lane axis.

    ym_ref : (6, M, TILE)  GMM params, param-major (pi, mux, muy, sx, sy, rho)
    px_ref : (8, TILE)     rows 0-4 = (dx, dy, p1, p2, p3), rows 5-7 = (q1..q3)
    out_ref: (1, TILE)     per-element pen-state loss Lp
    lsp_ref: (1, 128)      this tile's partial sum of log(sum_m pi*v)
    """
    f32 = jnp.float32
    i = pl.program_id(0)
    part = f32(0.0)

    # Strip-mine the lane axis: each sub-block keeps <= (8, sub) live arrays,
    # bounding vreg pressure (spills would co-dominate on v7x's faster HBM).
    for off in range(0, tile, sub):
        cur = min(sub, tile - off)
        csl = slice(off, off + cur)

        dx = px_ref[0:1, csl].astype(f32)                    # (1, cur)
        dy = px_ref[1:2, csl].astype(f32)

        # ---- GMM mixture density, chunked over <=8 components at a time -- #
        sum_m = jnp.zeros((1, cur), f32)
        for m0 in range(0, M, _SUBLANE):
            mc = min(_SUBLANE, M - m0)
            msl = slice(m0, m0 + mc)
            pi_m = ym_ref[0, msl, csl].astype(f32)           # (mc, cur)
            mux = ym_ref[1, msl, csl].astype(f32)
            muy = ym_ref[2, msl, csl].astype(f32)
            sx = jnp.maximum(ym_ref[3, msl, csl].astype(f32), 1e-6)
            sy = jnp.maximum(ym_ref[4, msl, csl].astype(f32), 1e-6)
            rho = jnp.clip(ym_ref[5, msl, csl].astype(f32), -0.999, 0.999)

            normx = (dx - mux) / sx
            normy = (dy - muy) / sy
            omr2 = 1.0 - rho * rho + 1e-6
            r = jax.lax.rsqrt(omr2)                          # 1/sqrt(1-rho^2+eps)
            z = normx * normx + normy * normy - 2.0 * rho * normx * normy
            expo = -z * (0.5 * (r * r))                      # == -z / (2*omr2)
            denom = _TWO_PI * sx * sy * (omr2 * r)           # == 2*pi*sx*sy*sqrt(omr2)
            v = jnp.exp(expo) / (denom + 1e-6)               # keep torch's +1e-6 guard
            sum_m = sum_m + jnp.sum(pi_m * v, axis=0, keepdims=True)

        log_sum = jnp.log(sum_m + 1e-9)                      # (1, cur)
        if needs_mask:
            lane = jax.lax.broadcasted_iota(jnp.int32, (1, cur), 1)
            valid = (i * tile + off + lane) < sb
            part = part + jnp.sum(jnp.where(valid, log_sum, 0.0))
        else:
            part = part + jnp.sum(log_sum)

        # ---- pen-state loss, vectorized over the 3 pen channels ---------- #
        p = px_ref[2:5, csl].astype(f32)                     # (3, cur)
        q = px_ref[5:8, csl].astype(f32)                     # (3, cur)
        lp = -jnp.sum(p * jnp.log(q + 1e-9), axis=0, keepdims=True) * inv_nmax
        out_ref[0:1, csl] = lp

    lsp_ref[...] = jnp.full((1, _LANE), part, dtype=f32)


def _round_up(v, m):
    return ((v + m - 1) // m) * m


def sketch_rnn_loss_packed(ym, px, annealed, *, Nmax, M, S, B, tile=8192):
    """Loss from pre-packed, lane-dense inputs (producer-side fused layout).

    ym       : (6, M, S*B)  GMM params, param-major (f32 or bf16)
    px       : (8, S*B)     rows (dx, dy, p1, p2, p3, q1, q2, q3), f32
    annealed : (B,)         wkl * eta_step * max(lkl, kl_min), f32
    """
    SB = S * B
    f32 = jnp.float32
    ym_item = jnp.dtype(ym.dtype).itemsize

    # Lane tile: multiple of 128, no larger than the (rounded-up) problem,
    # and clamped so the double-buffered footprint stays well under v5e's
    # 16 MiB default scoped-VMEM limit.
    tile = max(_LANE, (int(tile) // _LANE) * _LANE)
    tile = min(tile, _round_up(SB, _LANE))
    bytes_per_lane = 2 * (6 * M * ym_item + 8 * 4) + 2 * (4 + 4)
    budget = 12 * 1024 * 1024
    tile = min(tile, max(_LANE, (budget // bytes_per_lane) // _LANE * _LANE))
    nt = pl.cdiv(SB, tile)
    sub = min(512, tile)

    kernel = functools.partial(
        _sketch_rnn_loss_kernel, M=M, sb=SB, tile=tile, sub=sub,
        inv_nmax=1.0 / float(Nmax), needs_mask=(SB % tile) != 0)

    cost = pl.CostEstimate(
        flops=30 * SB * M,
        transcendentals=SB * (5 * M + 4),
        bytes_accessed=int(ym.size) * ym_item + int(px.size) * 4
                       + SB * 4 + nt * _LANE * 4)

    per_elem, parts = pl.pallas_call(
        kernel,
        grid=(nt,),
        in_specs=[
            pl.BlockSpec((6, M, tile), lambda i: (0, 0, i)),   # GMM params
            pl.BlockSpec((8, tile), lambda i: (0, i)),         # strokes + pen q
        ],
        out_specs=[
            pl.BlockSpec((1, tile), lambda i: (0, i)),         # per-element Lp
            pl.BlockSpec((1, _LANE), lambda i: (0, i)),        # per-tile Ls partial
        ],
        out_shape=[
            jax.ShapeDtypeStruct((1, SB), f32),
            jax.ShapeDtypeStruct((1, nt * _LANE), f32),
        ],
        compiler_params=pltpu.CompilerParams(
            dimension_semantics=("parallel",)),
        cost_estimate=cost,
    )(ym, px)

    # Finish the global Ls reduction (one scalar per tile) and broadcast-add
    # the scalar Ls and the (B,) annealed-KL term outside the kernel.
    ls = -jnp.sum(parts.reshape(nt, _LANE)[:, 0]) * (1.0 / float(Nmax))
    return per_elem[0].reshape(S, B) + ls + annealed[None, :]


def sketch_rnn_loss(y, x, mu, sig_hat, R, eta_min, wkl, step, kl_min=0.01, *,
                    Nmax, M, Nz, tile=8192, params_dtype=jnp.float32):
    """Drop-in forward of the PyTorch SKETCH_RNN_LOSS module."""
    S, B, _ = x.shape
    SB = S * B
    f32 = jnp.float32

    # Single relayout of the dominant tensor to the param-major, lane-dense
    # layout (one XLA copy; no separate pad / broadcast / ann streams).
    ym = (y[:, :, :6 * M].reshape(S, B, M, 6)
          .transpose(3, 2, 0, 1).reshape(6, M, SB).astype(params_dtype))
    # Strokes (dx,dy,p1,p2,p3) and pen-state probs (q1,q2,q3) fused into one
    # small (8, S*B) stream -> one DMA per grid step instead of three.
    px = jnp.concatenate(
        [x.transpose(2, 0, 1).reshape(5, SB).astype(f32),
         y[:, :, 6 * M:].transpose(2, 0, 1).reshape(3, SB).astype(f32)],
        axis=0)

    # KL / annealing term depends only on (B,) and scalars: pure XLA, added
    # after the kernel (matches the module: mu ** (-exp(sig_hat))).
    eta_step = 1.0 - (1.0 - eta_min) * (R ** step)
    mu32 = mu.astype(f32)
    sig32 = sig_hat.astype(f32)
    lkl = -(1.0 + sig32 - jnp.power(mu32, -jnp.exp(sig32))) / 2.0 * float(Nz)
    annealed = (wkl * eta_step) * jnp.maximum(lkl, f32(kl_min))      # (B,)

    return sketch_rnn_loss_packed(ym, px, annealed, Nmax=Nmax, M=M, S=S, B=B,
                                  tile=tile)


def reference_loss(y, x, mu, sig_hat, R, eta_min, wkl, step, kl_min, Nmax, M, Nz):
    """Pure-JAX mirror of the PyTorch forward (for verification)."""
    dx = x[..., 0]
    dy = x[..., 1]
    S, B, _ = x.shape
    ym = y[:, :, :6 * M].reshape(S, B, M, 6)
    pi = ym[..., 0]
    mux = ym[..., 1]
    muy = ym[..., 2]
    sx = jnp.maximum(ym[..., 3], 1e-6)
    sy = jnp.maximum(ym[..., 4], 1e-6)
    rho = jnp.clip(ym[..., 5], -0.999, 0.999)
    normx = (dx[..., None] - mux) / sx
    normy = (dy[..., None] - muy) / sy
    z = normx ** 2 + normy ** 2 - 2 * rho * normx * normy
    denom = 2 * math.pi * sx * sy * jnp.sqrt(1 - rho ** 2 + 1e-6)
    v = jnp.exp(-z / (2 * (1 - rho ** 2 + 1e-6))) / (denom + 1e-6)
    ls = -jnp.sum(jnp.log(jnp.sum(pi * v, axis=-1) + 1e-9)) / Nmax
    p1, p2, p3 = x[..., 2], x[..., 3], x[..., 4]
    q = y[:, :, 6 * M:]
    lp = -(p1 * jnp.log(q[..., 0] + 1e-9)
           + p2 * jnp.log(q[..., 1] + 1e-9)
           + p3 * jnp.log(q[..., 2] + 1e-9)) / Nmax
    lkl = -(1 + sig_hat - jnp.power(mu, -jnp.exp(sig_hat))) / 2 * Nz
    eta_step = 1.0 - (1.0 - eta_min) * R ** step
    annealed = wkl * eta_step * jnp.maximum(lkl, kl_min)
    return ls + lp + annealed[None, :]


if __name__ == "__main__":
    R, eta_min, wkl, step, kl_min = 0.9999, 0.01, 0.5, 100, 0.01
    key = jax.random.PRNGKey(0)

    configs = [
        # (S, B, M, Nz, tile)
        (16, 8, 4, 8, 8192),     # S*B == lane tile -> unmasked fast path
        (16, 6, 5, 8, 8192),     # ragged single tile, M not a multiple of 8
        (40, 37, 20, 16, 512),   # multi-tile grid, 3 M-chunks, ragged tail
    ]
    for (S, B, M, Nz, tile) in configs:
        Nmax = S
        key, k1, k2, k3, k4, k5 = jax.random.split(key, 6)
        # y: (S, B, 6*M + 3) -- GMM params + 3 pen probabilities
        y = jax.random.uniform(k1, (S, B, 6 * M + 3), jnp.float32, 0.1, 0.9)
        # x: (S, B, 5) -- (dx, dy, p1, p2, p3)
        dxdy = 0.1 * jax.random.normal(k2, (S, B, 2), jnp.float32)
        pvals = jax.random.uniform(k3, (S, B, 3), jnp.float32)
        x = jnp.concatenate([dxdy, pvals], axis=-1)
        # latent stats (positive mu so mu**(-exp(sig_hat)) is finite, as in torch)
        mu = jax.random.uniform(k4, (B,), jnp.float32, 0.2, 1.5)
        sig_hat = 0.1 * jax.random.normal(k5, (B,), jnp.float32)

        out = sketch_rnn_loss(y, x, mu, sig_hat, R, eta_min, wkl, step, kl_min,
                              Nmax=Nmax, M=M, Nz=Nz, tile=tile)
        out = jax.block_until_ready(out)
        ref = reference_loss(y, x, mu, sig_hat, R, eta_min, wkl, step, kl_min,
                             Nmax, M, Nz)
        assert out.shape == (S, B), out.shape
        assert jnp.allclose(out, ref, rtol=2e-3, atol=2e-3), (S, B, M)

    print("KERNEL_OK")
</pallas_src>

<mosaic_0001>
module attributes {stable_mosaic.version = 11 : i64} {
  func.func @_sketch_rnn_loss_kernel(%arg0: i32, %arg1: memref<6x4x128xf32, #tpu.memory_space<vmem>>, %arg2: memref<8x128xf32, #tpu.memory_space<vmem>>, %arg3: memref<1x128xf32, #tpu.memory_space<vmem>>, %arg4: memref<1x128xf32, #tpu.memory_space<vmem>>) attributes {dimension_semantics = [#tpu.dimension_semantics<parallel>], iteration_bounds = array<i64: 1>, scalar_prefetch = 0 : i64, scratch_operands = 0 : i64, tpu.core_type = #tpu.core_type<tc>, window_params = [{transform_indices = @transform_0, window_bounds = array<i64: 6, 4, 128>}, {transform_indices = @transform_1, window_bounds = array<i64: 8, 128>}, {transform_indices = @transform_2, window_bounds = array<i64: 1, 128>}, {transform_indices = @transform_3, window_bounds = array<i64: 1, 128>}]} {
    %c0 = arith.constant 0 : index
    %c0_0 = arith.constant 0 : index
    %0 = vector.load %arg2[%c0, %c0_0] : memref<8x128xf32, #tpu.memory_space<vmem>>, vector<1x128xf32>
    %c1 = arith.constant 1 : index
    %c0_1 = arith.constant 0 : index
    %1 = vector.load %arg2[%c1, %c0_1] : memref<8x128xf32, #tpu.memory_space<vmem>>, vector<1x128xf32>
    %cst = arith.constant 0.000000e+00 : f32
    %2 = vector.broadcast %cst : f32 to vector<1x128xf32>
    %c0_2 = arith.constant 0 : index
    %c0_3 = arith.constant 0 : index
    %c0_4 = arith.constant 0 : index
    %3 = vector.load %arg1[%c0_2, %c0_3, %c0_4] : memref<6x4x128xf32, #tpu.memory_space<vmem>>, vector<1x4x128xf32>
    %4 = vector.shape_cast %3 : vector<1x4x128xf32> to vector<4x128xf32>
    %c1_5 = arith.constant 1 : index
    %c0_6 = arith.constant 0 : index
    %c0_7 = arith.constant 0 : index
    %5 = vector.load %arg1[%c1_5, %c0_6, %c0_7] : memref<6x4x128xf32, #tpu.memory_space<vmem>>, vector<1x4x128xf32>
    %6 = vector.shape_cast %5 : vector<1x4x128xf32> to vector<4x128xf32>
    %c2 = arith.constant 2 : index
    %c0_8 = arith.constant 0 : index
    %c0_9 = arith.constant 0 : index
    %7 = vector.load %arg1[%c2, %c0_8, %c0_9] : memref<6x4x128xf32, #tpu.memory_space<vmem>>, vector<1x4x128xf32>
    %8 = vector.shape_cast %7 : vector<1x4x128xf32> to vector<4x128xf32>
    %c3 = arith.constant 3 : index
    %c0_10 = arith.constant 0 : index
    %c0_11 = arith.constant 0 : index
    %9 = vector.load %arg1[%c3, %c0_10, %c0_11] : memref<6x4x128xf32, #tpu.memory_space<vmem>>, vector<1x4x128xf32>
    %10 = vector.shape_cast %9 : vector<1x4x128xf32> to vector<4x128xf32>
    %cst_12 = arith.constant 9.99999997E-7 : f32
    %11 = vector.broadcast %cst_12 : f32 to vector<4x128xf32>
    %12 = arith.maximumf %10, %11 : vector<4x128xf32>
    %c4 = arith.constant 4 : index
    %c0_13 = arith.constant 0 : index
    %c0_14 = arith.constant 0 : index
    %13 = vector.load %arg1[%c4, %c0_13, %c0_14] : memref<6x4x128xf32, #tpu.memory_space<vmem>>, vector<1x4x128xf32>
    %14 = vector.shape_cast %13 : vector<1x4x128xf32> to vector<4x128xf32>
    %cst_15 = arith.constant 9.99999997E-7 : f32
    %15 = vector.broadcast %cst_15 : f32 to vector<4x128xf32>
    %16 = arith.maximumf %14, %15 : vector<4x128xf32>
    %c5 = arith.constant 5 : index
    %c0_16 = arith.constant 0 : index
    %c0_17 = arith.constant 0 : index
    %17 = vector.load %arg1[%c5, %c0_16, %c0_17] : memref<6x4x128xf32, #tpu.memory_space<vmem>>, vector<1x4x128xf32>
    %18 = vector.shape_cast %17 : vector<1x4x128xf32> to vector<4x128xf32>
    %cst_18 = arith.constant -9.990000e-01 : f32
    %cst_19 = arith.constant 9.990000e-01 : f32
    %19 = vector.broadcast %cst_18 : f32 to vector<4x128xf32>
    %20 = arith.maximumf %19, %18 : vector<4x128xf32>
    %21 = vector.broadcast %cst_19 : f32 to vector<4x128xf32>
    %22 = arith.minimumf %21, %20 : vector<4x128xf32>
    %23 = vector.broadcast %0 : vector<1x128xf32> to vector<4x128xf32>
    %24 = arith.subf %23, %6 : vector<4x128xf32>
    %25 = arith.divf %24, %12 : vector<4x128xf32>
    %26 = vector.broadcast %1 : vector<1x128xf32> to vector<4x128xf32>
    %27 = arith.subf %26, %8 : vector<4x128xf32>
    %28 = arith.divf %27, %16 : vector<4x128xf32>
    %29 = arith.mulf %22, %22 : vector<4x128xf32>
    %cst_20 = arith.constant 1.000000e+00 : f32
    %30 = vector.broadcast %cst_20 : f32 to vector<4x128xf32>
    %31 = arith.subf %30, %29 : vector<4x128xf32>
    %cst_21 = arith.constant 9.99999997E-7 : f32
    %32 = vector.broadcast %cst_21 : f32 to vector<4x128xf32>
    %33 = arith.addf %31, %32 : vector<4x128xf32>
    %34 = math.rsqrt %33 : vector<4x128xf32>
    %35 = arith.mulf %25, %25 : vector<4x128xf32>
    %36 = arith.mulf %28, %28 : vector<4x128xf32>
    %37 = arith.addf %35, %36 : vector<4x128xf32>
    %cst_22 = arith.constant 2.000000e+00 : f32
    %38 = vector.broadcast %cst_22 : f32 to vector<4x128xf32>
    %39 = arith.mulf %38, %22 : vector<4x128xf32>
    %40 = arith.mulf %39, %25 : vector<4x128xf32>
    %41 = arith.mulf %40, %28 : vector<4x128xf32>
    %42 = arith.subf %37, %41 : vector<4x128xf32>
    %cst_23 = arith.constant 0.000000e+00 : f32
    %43 = vector.broadcast %cst_23 : f32 to vector<4x128xf32>
    %44 = arith.subf %43, %42 : vector<4x128xf32>
    %45 = arith.mulf %34, %34 : vector<4x128xf32>
    %cst_24 = arith.constant 5.000000e-01 : f32
    %46 = vector.broadcast %cst_24 : f32 to vector<4x128xf32>
    %47 = arith.mulf %46, %45 : vector<4x128xf32>
    %48 = arith.mulf %44, %47 : vector<4x128xf32>
    %cst_25 = arith.constant 6.28318548 : f32
    %49 = vector.broadcast %cst_25 : f32 to vector<4x128xf32>
    %50 = arith.mulf %49, %12 : vector<4x128xf32>
    %51 = arith.mulf %50, %16 : vector<4x128xf32>
    %52 = arith.mulf %33, %34 : vector<4x128xf32>
    %53 = arith.mulf %51, %52 : vector<4x128xf32>
    %54 = math.exp %48 : vector<4x128xf32>
    %cst_26 = arith.constant 9.99999997E-7 : f32
    %55 = vector.broadcast %cst_26 : f32 to vector<4x128xf32>
    %56 = arith.addf %53, %55 : vector<4x128xf32>
    %57 = arith.divf %54, %56 : vector<4x128xf32>
    %58 = arith.mulf %4, %57 : vector<4x128xf32>
    %cst_27 = arith.constant dense<0.000000e+00> : vector<128xf32>
    %59 = vector.multi_reduction <add>, %58, %cst_27 [0] : vector<4x128xf32> to vector<128xf32>
    %60 = vector.shape_cast %59 : vector<128xf32> to vector<1x128xf32>
    %61 = arith.addf %2, %60 : vector<1x128xf32>
    %cst_28 = arith.constant 9.99999971E-10 : f32
    %62 = vector.broadcast %cst_28 : f32 to vector<1x128xf32>
    %63 = arith.addf %61, %62 : vector<1x128xf32>
    %64 = math.log %63 : vector<1x128xf32>
    %65 = vector.shape_cast %64 : vector<1x128xf32> to vector<1x1x128xf32>
    %cst_29 = arith.constant dense<0.000000e+00> : vector<1xf32>
    %66 = vector.multi_reduction <add>, %65, %cst_29 [1, 2] : vector<1x1x128xf32> to vector<1xf32>
    %67 = vector.shape_cast %66 : vector<1xf32> to vector<1x1x1xf32>
    %68 = vector.extract %67[0, 0, 0] : f32 from vector<1x1x1xf32>
    %cst_30 = arith.constant 0.000000e+00 : f32
    %69 = arith.addf %cst_30, %68 : f32
    %c2_31 = arith.constant 2 : index
    %c0_32 = arith.constant 0 : index
    %70 = vector.load %arg2[%c2_31, %c0_32] : memref<8x128xf32, #tpu.memory_space<vmem>>, vector<3x128xf32>
    %c5_33 = arith.constant 5 : index
    %c0_34 = arith.constant 0 : index
    %71 = vector.load %arg2[%c5_33, %c0_34] : memref<8x128xf32, #tpu.memory_space<vmem>>, vector<3x128xf32>
    %cst_35 = arith.constant 9.99999971E-10 : f32
    %72 = vector.broadcast %cst_35 : f32 to vector<3x128xf32>
    %73 = arith.addf %71, %72 : vector<3x128xf32>
    %74 = math.log %73 : vector<3x128xf32>
    %75 = arith.mulf %70, %74 : vector<3x128xf32>
    %cst_36 = arith.constant dense<0.000000e+00> : vector<128xf32>
    %76 = vector.multi_reduction <add>, %75, %cst_36 [0] : vector<3x128xf32> to vector<128xf32>
    %77 = vector.shape_cast %76 : vector<128xf32> to vector<1x128xf32>
    %cst_37 = arith.constant 0.000000e+00 : f32
    %78 = vector.broadcast %cst_37 : f32 to vector<1x128xf32>
    %79 = arith.subf %78, %77 : vector<1x128xf32>
    %cst_38 = arith.constant 6.250000e-02 : f32
    %80 = vector.broadcast %cst_38 : f32 to vector<1x128xf32>
    %81 = arith.mulf %79, %80 : vector<1x128xf32>
    %c0_39 = arith.constant 0 : index
    %c0_40 = arith.constant 0 : index
    %82 = vector.load %arg3[%c0_39, %c0_40] : memref<1x128xf32, #tpu.memory_space<vmem>>, vector<1x128xf32>
    tpu.vector_store %arg3[%c0_39, %c0_40], %81 {strides = array<i32>} : memref<1x128xf32, #tpu.memory_space<vmem>>, vector<1x128xf32>,
    %83 = vector.broadcast %69 : f32 to vector<1x128xf32>
    %c0_41 = arith.constant 0 : index
    %c0_42 = arith.constant 0 : index
    %84 = vector.load %arg4[%c0_41, %c0_42] : memref<1x128xf32, #tpu.memory_space<vmem>>, vector<1x128xf32>
    tpu.vector_store %arg4[%c0_41, %c0_42], %83 {strides = array<i32>} : memref<1x128xf32, #tpu.memory_space<vmem>>, vector<1x128xf32>,
    return
  }
  func.func @transform_0(%arg0: i32) -> (i32, i32, i32) {
    %c0_i32 = arith.constant 0 : i32
    %c0_i32_0 = arith.constant 0 : i32
    %c0_i32_1 = arith.constant 0 : i32
    return %c0_i32, %c0_i32_0, %arg0 : i32, i32, i32
  }
  func.func @transform_1(%arg0: i32) -> (i32, i32) {
    %c0_i32 = arith.constant 0 : i32
    %c0_i32_0 = arith.constant 0 : i32
    return %c0_i32, %arg0 : i32, i32
  }
  func.func @transform_2(%arg0: i32) -> (i32, i32) {
    %c0_i32 = arith.constant 0 : i32
    %c0_i32_0 = arith.constant 0 : i32
    return %c0_i32, %arg0 : i32, i32
  }
  func.func @transform_3(%arg0: i32) -> (i32, i32) {
    %c0_i32 = arith.constant 0 : i32
    %c0_i32_0 = arith.constant 0 : i32
    return %c0_i32, %arg0 : i32, i32
  }
}

</mosaic_0001>

<bundles_post_ra>
// kernel: tpu_custom_call.1
= control target key start
LH: loop header
LB: loop body
LE: loop exit
PB: predicated region body
PF: predicated region fallthrough
CT: control target
= control target key end

     0   :  { %9 = vsyncpa [#allocation3], 0  ;;  %s388_s0 = inlined_call_operand.hbm [shape: f32[6,4,128], index: 0, kind: input, shape index: {}]   ;;  %s389_s1 = inlined_call_operand.hbm [shape: f32[8,128], index: 1, kind: input, shape index: {}]   ;;  %s390_s2 = inlined_call_operand.hbm [shape: f32[1,128], index: 2, kind: output, shape index: {0}]   ;;  %s391_s3 = inlined_call_operand.hbm [shape: f32[1,128], index: 3, kind: output, shape index: {1}]  }
   0x1   :  { %10 = vsyncpa [#allocation6], 0 }
   0x2   :  { %11 = vsyncpa [#allocation4], 0 }
   0x3   :  { %12 = vsyncpa [#allocation9], 0  ;;  %s17_s14 = sshll.u32 %s388_s0, 4  ;;  %s349_s15 = smov [#allocation2]   ;;  %s18_s14 = int_to_ptr.hbm [resolvable:$true] %s17_s14 }
   0x4   :  { %s19_s16 = sshll.u32 %s349_s15, 4  ;;  %s31_s19 = sshll.u32 %s389_s1, 4  ;;  %s20_s16 = int_to_ptr.vmem [resolvable:$true] %s19_s16  ;;  %s32_s19 = int_to_ptr.hbm [resolvable:$true] %s31_s19 }
   0x5   :  { %s350_s20 = smov 64   ;;  %s351_s21 = smov 4  }
   0x6   :  { %25 = dma.hbm_to_vmem [thread:$0]  %s18_s14, 384, %s20_s16, [#allocation3], %s350_s20, %s350_s20, %s351_s21  }
   0x7   :  { %s352_s22 = smov [#allocation5]  }
   0x8   :  { %s33_s23 = sshll.u32 %s352_s22, 4  ;;  %s34_s23 = int_to_ptr.vmem [resolvable:$true] %s33_s23 }
   0x9   :  { %36 = dma.hbm_to_vmem [thread:$0]  %s32_s19, 128, %s34_s23, [#allocation6]  }
   0xa   :  { %341 = dma.done.wait [#allocation3], 384  }
   0xb   :  { %342 = vsyncadd [#allocation3], 4294966912 }
   0xc   :  { %343 = dma.done.wait [#allocation6], 128  }
   0xd   :  { %344 = vsyncadd [#allocation6], 4294967168  ;;  %v53_v0 = vld [vmem:[#allocation2 + $0xc] sm:$0xf]  ;;  %v56_v2 = vld [vmem:[#allocation2 + $0x10] sm:$0xf] }
   0xe   :  { %v54_v1 = vmax.f32 %v53_v0, 1e-06  ;;  %v59_v3 = vld [vmem:[#allocation2 + $0x14] sm:$0xf]  ;;  %v57_v4 = vmax.f32 %v56_v2, 1e-06 }
   0xf   :  { %v220_v5 = vclamps-f32 %v59_v3, 0.999  ;;  %v49_v15 = vld [vmem:[#allocation2 + $0x4] sm:$0xf]  ;;  %v229_v16 = vld [vmem:[#allocation5] ss:$0 sm:$0xff] }
  0x10   :  { %231 = vrcp.f32 %v54_v1  ;;  %vm69_vm0 = vweird.f32 %v54_v1  ;;  %v73_v12 = vand.u32 2147483647, %v54_v1  ;;  %v75_v13 = vand.u32 2147483648, %v54_v1  ;;  %v230_v19 = vld [vmem:[#allocation5 + $0x1] ss:$0 sm:$0xff]  ;;  %s353_s0 = smov [#allocation7]  }
  0x11   :  { %233 = vrcp.f32 %v57_v4  ;;  %v96_v6 = vmul.f32 %v220_v5, %v220_v5  ;;  %v92_v18 = vand.u32 2147483648, %v57_v4  ;;  %vm86_vm2 = vweird.f32 %v57_v4  ;;  %v51_v22 = vld [vmem:[#allocation2 + $0x8] sm:$0xf]  ;;  %s191_s1 = sshll.u32 %s353_s0, 4  ;;  %s193_s26 = sshll.u32 %s390_s2, 4  ;;  %s192_s1 = int_to_ptr.vmem [resolvable:$true] %s191_s1  ;;  %s194_s26 = int_to_ptr.hbm [resolvable:$true] %s193_s26 }
  0x12   :  { %v90_v21 = vand.u32 2147483647, %v57_v4  ;;  %v76_v24 = vor.u32 1.1754944e-38, %v75_v13  ;;  %v63_v26 = vsub.f32 %v229_v16, %v49_v15  ;;  %vm74_vm5 = vcmp.eq.f32.partialorder %v73_v12, 8.507059e+37  ;;  %s354_s27 = smov [#allocation8]   ;;  %s204_s4 = sshll.u32 %s391_s3, 4  ;;  %s205_s4 = int_to_ptr.hbm [resolvable:$true] %s204_s4 }
  0x13   :  { %v97_v7 = vsub.f32 1.0, %v96_v6  ;;  %v93_v28 = vor.u32 1.1754944e-38, %v92_v18  ;;  %v80_v29 = vsub.f32 %v230_v19, %v51_v22  ;;  %v112_v33 = vmul.f32 2.0, %v220_v5  ;;  %s202_s28 = sshll.u32 %s354_s27, 4  ;;  %s203_s28 = int_to_ptr.vmem [resolvable:$true] %s202_s28 }
  0x14   :  { %vm91_vm7 = vcmp.eq.f32.partialorder %v90_v21, 8.507059e+37  ;;  %v120_v46 = vmul.f32 6.2831855, %v54_v1  ;;  %vm143_vm15 = vcmask 1043456  }
  0x15   :  { %v98_v11 = vadd.f32 1e-06, %v97_v7  ;;  %v47_v7 = vld [vmem:[#allocation2] sm:$0xf] }
  0x16   :  { %v232_v8 = vpop.eup %231  ;;  %v121_v51 = vmul.f32 %v120_v46, %v57_v4 }
  0x17   :  { %v234_v9 = vpop.eup %233  ;;  %v65_v10 = vmul.f32 %v232_v8, %v54_v1  ;;  %vm70_vm1 = vweird.f32 %v232_v8  ;;  %235 = vrsqrt.f32 %v98_v11  ;;  %vm105_vm8 = vweird.f32 %v98_v11 }
  0x18   :  { %v82_v14 = vmul.f32 %v234_v9, %v57_v4  ;;  %vm87_vm3 = vweird.f32 %v234_v9  ;;  %vm71_vm4 = vmor %vm69_vm0, %vm70_vm1  ;;  %vm155_vm0 = vcmask 1040384   ;;  %vm173_vm1 = vcmask 1042432  }
  0x19   :  { %v66_v17 = vsub.f32 1.0, %v65_v10  ;;  %vm88_vm6 = vmor %vm86_vm2, %vm87_vm3 }
  0x1a   :  { %v83_v20 = vsub.f32 1.0, %v82_v14 }
  0x1b   :  { %v67_v23 = vmul.f32 %v232_v8, %v66_v17 }
  0x1c   :  { %v84_v25 = vmul.f32 %v234_v9, %v83_v20 }
  0x1d   :  { %v68_v27 = vadd.f32 %v232_v8, %v67_v23  ;;  %v236_v31 = vpop.eup %235 }
  0x1e   :  { %v85_v30 = vadd.f32 %v234_v9, %v84_v25  ;;  %v100_v36 = vmul.f32 %v236_v31, %v98_v11  ;;  %vm106_vm9 = vweird.f32 %v236_v31 }
  0x1f   :  { %v72_v32 = vsel %vm71_vm4, %v232_v8, %v68_v27  ;;  %vm107_vm10 = vmor %vm105_vm8, %vm106_vm9 }
  0x20   :  { %v77_v34 = vsel %vm74_vm5, %v76_v24, %v72_v32  ;;  %v89_v35 = vsel %vm88_vm6, %v234_v9, %v85_v30  ;;  %v101_v40 = vmul.f32 %v236_v31, %v100_v36  ;;  %v168_v24 = vld [vmem:[#allocation5 + $0x5] sm:$0x7] }
  0x21   :  { %v78_v37 = vmul.f32 %v77_v34, %v63_v26  ;;  %v94_v38 = vsel %vm91_vm7, %v93_v28, %v89_v35  ;;  %v169_v25 = vadd.f32 1e-09, %v168_v24 }
  0x22   :  { %v95_v39 = vmul.f32 %v94_v38, %v80_v29  ;;  %v102_v43 = vmul.f32 0.5, %v101_v40 }
  0x23   :  { %v109_v41 = vmul.f32 %v78_v37, %v78_v37  ;;  %v113_v42 = vmul.f32 %v112_v33, %v78_v37  ;;  %v167_v33 = vld [vmem:[#allocation5 + $0x2] sm:$0x7] }
  0x24   :  { %v110_v44 = vmul.f32 %v95_v39, %v95_v39  ;;  %v103_v47 = vsub.f32 1.5, %v102_v43 }
  0x25   :  { %v114_v45 = vmul.f32 %v113_v42, %v95_v39 }
  0x26   :  { %v111_v48 = vadd.f32 %v110_v44, %v109_v41  ;;  %v104_v49 = vmul.f32 %v236_v31, %v103_v47 }
  0x28   :  { %v115_v50 = vsub.f32 %v111_v48, %v114_v45  ;;  %v108_v52 = vsel %vm107_vm10, %v236_v31, %v104_v49 }
  0x29   :  { %v117_v53 = vmul.f32 %v108_v52, %v108_v52  ;;  %v122_v54 = vmul.f32 %v108_v52, %v98_v11 }
  0x2a   :  { %v116_v55 = vsub.f32 0.0, %v115_v50 }
  0x2b   :  { %v118_v56 = vmul.f32 0.5, %v117_v53  ;;  %v123_v57 = vmul.f32 %v122_v54, %v121_v51 }
  0x2d   :  { %v126_v58 = vadd.f32 1e-06, %v123_v57  ;;  %v119_v59 = vmul.f32 %v118_v56, %v116_v55 }
  0x2f   :  { %237 = vrcp.f32 %v126_v58  ;;  %v124_v60 = vmul.f32 1.442695, %v119_v59  ;;  %v138_v63 = vand.u32 2147483648, %v126_v58  ;;  %vm132_vm11 = vweird.f32 %v126_v58 }
  0x30   :  { %v136_v1 = vand.u32 2147483647, %v126_v58 }
  0x31   :  { %239 = vpow2.f32 %v124_v60  ;;  %v139_v3 = vor.u32 1.1754944e-38, %v138_v63 }
  0x32   :  { %vm137_vm14 = vcmp.eq.f32.partialorder %v136_v1, 8.507059e+37 }
  0x35   :  { %v238_v61 = vpop.eup %237 }
  0x36   :  { %v128_v62 = vmul.f32 %v238_v61, %v126_v58  ;;  %vm133_vm12 = vweird.f32 %v238_v61 }
  0x37   :  { %vm134_vm13 = vmor %vm132_vm11, %vm133_vm12  ;;  %v240_v5 = vpop.eup %239 }
  0x38   :  { %v129_v0 = vsub.f32 1.0, %v128_v62 }
  0x3a   :  { %v130_v2 = vmul.f32 %v238_v61, %v129_v0 }
  0x3c   :  { %v131_v4 = vadd.f32 %v238_v61, %v130_v2 }
  0x3e   :  { %v135_v6 = vsel %vm134_vm13, %v238_v61, %v131_v4 }
  0x3f   :  { %v140_v8 = vsel %vm137_vm14, %v139_v3, %v135_v6 }
  0x40   :  { %v141_v9 = vmul.f32 %v240_v5, %v140_v8 }
  0x42   :  { %v142_v10 = vmul.f32 %v141_v9, %v47_v7 }
  0x44   :  { %v144_v11 = vsel %vm143_vm15, %v142_v10, 0.0 }
  0x45   :  { %v145_v12 = vrot.slane %v144_v11, 4 }
  0x47   :  { %v146_v13 = vadd.f32 %v145_v12, %v144_v11 }
  0x49   :  { %v147_v14 = vrot.slane %v146_v13, 2 }
  0x4b   :  { %v148_v15 = vadd.f32 %v147_v14, %v146_v13 }
  0x4d   :  { %v149_v16 = vrot.slane %v148_v15, 1 }
  0x4f   :  { %v150_v17 = vadd.f32 %v149_v16, %v148_v15 }
  0x51   :  { %v152_v18 = vadd.f32 1e-09, %v150_v17 }
  0x53   :  { %241 = vlog2.f32 %v152_v18 }
  0x54   :  { %243 = vlog2.f32 %v169_v25 }
  0x59   :  { %v242_v19 = vpop.eup %241 }
  0x5a   :  { %v154_v20 = vmul.f32 0.6931472, %v242_v19  ;;  %v244_v30 = vpop.eup %243 }
  0x5b   :  { %v171_v32 = vmul.f32 0.6931472, %v244_v30 }
  0x5c   :  { %v156_v21 = vsel %vm155_vm0, %v154_v20, 0.0 }
  0x5d   :  { %157 = vadd.xlane.f32.xlu0 %v156_v21  ;;  %v172_v34 = vmul.f32 %v171_v32, %v167_v33 }
  0x5f   :  { %v174_v35 = vsel %vm173_vm1, %v172_v34, 0.0 }
  0x60   :  { %v175_v36 = vrot.slane %v174_v35, 4 }
  0x62   :  { %v176_v37 = vadd.f32 %v175_v36, %v174_v35 }
  0x64   :  { %v177_v38 = vrot.slane %v176_v37, 2 }
  0x66   :  { %v178_v39 = vadd.f32 %v177_v38, %v176_v37 }
  0x68   :  { %v179_v40 = vrot.slane %v178_v39, 1 }
  0x6a   :  { %v180_v41 = vadd.f32 %v179_v40, %v178_v39 }
  0x6c   :  { %v181_v42 = vsub.f32 0.0, %v180_v41 }
  0x6e   :  { %v182_v43 = vmul.f32 0.0625, %v181_v42 }
  0x70   :  { %183 = vst [vmem:[#allocation7] sm:$0x1] %v182_v43 }
  0x71   :  { %196 = dma.vmem_to_hbm [thread:$0]  %s192_s1, 16, %s194_s26, [#allocation4]  }
  0xd0   :  { %v158_v22 = vpop.xlane.xlu0 %157 }
  0xd1   :  { %v159_v23 = vrot.slane %v158_v22, 4 }
  0xd3   :  { %v160_v26 = vadd.f32 %v159_v23, %v158_v22 }
  0xd5   :  { %v161_v27 = vrot.slane %v160_v26, 2 }
  0xd7   :  { %v162_v28 = vadd.f32 %v161_v27, %v160_v26 }
  0xd9   :  { %v163_v29 = vrot.slane %v162_v28, 1 }
  0xdb   :  { %v164_v31 = vadd.f32 %v163_v29, %v162_v28 }
  0xdd   :  { %221 = vpush %v164_v31 }
 0x10e   :  { %s222_s5 = spop %221 }
 0x10f   :  { %v184_v44 = vstv %s222_s5 }
 0x110   :  { %185 = vst [vmem:[#allocation8] sm:$0x1] %v184_v44 }
 0x111   :  { %207 = dma.vmem_to_hbm [thread:$0]  %s203_s28, 16, %s205_s4, [#allocation9]  }
 0x112   :  { %345 = dma.done.wait [#allocation4], 16  }
 0x113   :  { %346 = vsyncadd [#allocation4], 4294967280 }
 0x114   :  { %347 = dma.done.wait [#allocation9], 16  }
 0x115   :  { %348 = vsyncadd [#allocation9], 4294967280 }
 0x116   :  { %216 = vsyncpa [#allocation3], 1 }
 0x117   :  { %217 = vsyncpa [#allocation6], 1 }
 0x118   :  { %218 = vsyncpa [#allocation4], 1 }
 0x119   :  { %219 = vsyncpa [#allocation9], 1 }

</bundles_post_ra>
